<compile_context>
chip_gen: v7x
topology: tpu7x:2x2x1
jax: 0.10.0
libtpu: 0.0.40
codegen_flags: <defaults>
</compile_context>

<pallas_src>
import functools

import jax
import jax.numpy as jnp
from jax.experimental import pallas as pl
from jax.experimental.pallas import tpu as pltpu


def _round_up(x, m):
    return ((x + m - 1) // m) * m


def _build_kernel(B, BP, T, I, H, L, R_WIH, R_WHH, R_B, R_FCW, R_FCB):
    FH = 4 * H

    def kernel(x_ref, p_ref, out_ref):
        # --- unpack the parameter slab with static, sublane-aligned slices ---
        wih = p_ref[R_WIH:R_WIH + I, :FH]           # (I, 4H)
        whh = p_ref[R_WHH:R_WHH + H, :FH]           # (H, 4H) resident over loop
        b = p_ref[R_B:R_B + 1, :FH]                 # (1, 4H)

        # Hoisted input projection: one MXU pass covers every timestep.
        xg = (jnp.dot(x_ref[...], wih, preferred_element_type=jnp.float32)
              + b)                                  # (T*BP, 4H)

        h = jnp.zeros((BP, H), jnp.float32)
        c = jnp.zeros((BP, H), jnp.float32)

        # Fully unrolled serial recurrence (T=8): static slices, 8-aligned
        # sublane offsets thanks to the padded batch, one MXU push per step.
        for t in range(T):
            gates = xg[t * BP:(t + 1) * BP, :] + jnp.dot(
                h, whh, preferred_element_type=jnp.float32)   # (BP, 4H)

            # Gate layout is [i, f, o, g]: sigmoid over contiguous 3H prefix,
            # tanh over the H suffix.
            sig = jax.nn.sigmoid(gates[:, :3 * H])
            g_g = jnp.tanh(gates[:, 3 * H:])
            i_g = sig[:, 0:H]
            f_g = sig[:, H:2 * H]
            o_g = sig[:, 2 * H:3 * H]

            c = f_g * c + i_g * g_g
            h = o_g * jnp.tanh(c)

        # BatchNorm1d constructed fresh inside forward() -> training mode:
        # batch mean and *biased* variance over the REAL B rows only
        # (pad rows masked out), gamma=1, beta=0, eps=1e-5.
        rows = jax.lax.broadcasted_iota(jnp.int32, (BP, H), 0)
        mask = (rows < B).astype(jnp.float32)
        inv_b = 1.0 / B
        mean = jnp.sum(h * mask, axis=0, keepdims=True) * inv_b
        diff = (h - mean) * mask
        var = jnp.sum(diff * diff, axis=0, keepdims=True) * inv_b
        h_bn = (h - mean) * jax.lax.rsqrt(var + 1e-5)

        # Lane-dense final linear + ReLU: fc weights are zero-padded to L=128
        # output lanes, so the store is a full unmasked (BP, 128) block.
        fcw = p_ref[R_FCW:R_FCW + H, :]             # (H, L)
        fcb = p_ref[R_FCB:R_FCB + 1, :]             # (1, L)
        y = jnp.dot(h_bn, fcw, preferred_element_type=jnp.float32) + fcb
        out_ref[...] = jnp.maximum(y, 0.0)

    return kernel


def lstm_predictor_forward(x, params):
    """x: (B, T, I) ; params: PyTorch-native tensors ; returns (B, O)."""
    w_ih, w_hh, b_ih, b_hh, fc_w, fc_b = params
    x = x.astype(jnp.float32)
    B, T, I = x.shape
    H = w_hh.shape[1]
    O = fc_w.shape[0]

    BP = _round_up(B, 8)                 # pad batch to the f32 sublane granule
    L = _round_up(max(4 * H, O), 128)    # lane-padded slab / output width

    # ---- gate reorder [i,f,g,o] -> [i,f,o,g] and pre-transpose -------------
    idx = jnp.concatenate([jnp.arange(0, 2 * H),
                           jnp.arange(3 * H, 4 * H),
                           jnp.arange(2 * H, 3 * H)])
    wih_t = w_ih.T[:, idx]                         # (I, 4H)
    whh_t = w_hh.T[:, idx]                         # (H, 4H)
    bias = (b_ih + b_hh)[idx]                      # (4H,)
    fcw_t = fc_w.T                                 # (H, O)

    # ---- pack all constants into one lane-padded slab (single DMA) ---------
    R_WIH = 0
    R_WHH = _round_up(R_WIH + I, 8)
    R_B = _round_up(R_WHH + H, 8)
    R_FCW = _round_up(R_B + 1, 8)
    R_FCB = _round_up(R_FCW + H, 8)
    n_rows = _round_up(R_FCB + 1, 8)

    slab = jnp.zeros((n_rows, L), jnp.float32)
    slab = slab.at[R_WIH:R_WIH + I, :4 * H].set(wih_t)
    slab = slab.at[R_WHH:R_WHH + H, :4 * H].set(whh_t)
    slab = slab.at[R_B, :4 * H].set(bias)
    slab = slab.at[R_FCW:R_FCW + H, :O].set(fcw_t)
    slab = slab.at[R_FCB, :O].set(fc_b)

    # ---- time-major, batch-padded input: (T*BP, I), 8-aligned per step -----
    x_tm = jnp.transpose(x, (1, 0, 2))                        # (T, B, I)
    x_pad = jnp.zeros((T, BP, I), jnp.float32).at[:, :B, :].set(x_tm)
    x_flat = x_pad.reshape(T * BP, I)

    kernel = _build_kernel(B, BP, T, I, H, L,
                           R_WIH, R_WHH, R_B, R_FCW, R_FCB)

    vmem = pltpu.MemorySpace.VMEM
    out = pl.pallas_call(
        kernel,
        out_shape=jax.ShapeDtypeStruct((BP, L), jnp.float32),
        in_specs=[pl.BlockSpec(memory_space=vmem),
                  pl.BlockSpec(memory_space=vmem)],
        out_specs=pl.BlockSpec(memory_space=vmem),
    )(x_flat, slab)

    return out[:B, :O]


def make_params(key, input_size, hidden_size, output_size):
    """Deterministic synthetic parameters, PyTorch-native layout & init."""
    ks = jax.random.split(key, 6)
    bound_l = 1.0 / jnp.sqrt(hidden_size)
    w_ih = jax.random.uniform(ks[0], (4 * hidden_size, input_size),
                              jnp.float32, -bound_l, bound_l)
    w_hh = jax.random.uniform(ks[1], (4 * hidden_size, hidden_size),
                              jnp.float32, -bound_l, bound_l)
    b_ih = jax.random.uniform(ks[2], (4 * hidden_size,), jnp.float32,
                              -bound_l, bound_l)
    b_hh = jax.random.uniform(ks[3], (4 * hidden_size,), jnp.float32,
                              -bound_l, bound_l)
    bound_f = 1.0 / jnp.sqrt(hidden_size)
    fc_w = jax.random.uniform(ks[4], (output_size, hidden_size), jnp.float32,
                              -bound_f, bound_f)
    fc_b = jax.random.uniform(ks[5], (output_size,), jnp.float32,
                              -bound_f, bound_f)
    return (w_ih, w_hh, b_ih, b_hh, fc_w, fc_b)


def reference_forward(x, params):
    """Pure-JAX reference (PyTorch [i,f,g,o] gate order) for correctness."""
    w_ih, w_hh, b_ih, b_hh, fc_w, fc_b = params
    x = x.astype(jnp.float32)
    B, T, I = x.shape
    H = w_hh.shape[1]
    wih_t, whh_t = w_ih.T, w_hh.T
    b = (b_ih + b_hh)[None, :]
    h = jnp.zeros((B, H), jnp.float32)
    c = jnp.zeros((B, H), jnp.float32)
    for t in range(T):
        g = x[:, t, :] @ wih_t + h @ whh_t + b
        i_g = jax.nn.sigmoid(g[:, :H])
        f_g = jax.nn.sigmoid(g[:, H:2 * H])
        g_g = jnp.tanh(g[:, 2 * H:3 * H])
        o_g = jax.nn.sigmoid(g[:, 3 * H:])
        c = f_g * c + i_g * g_g
        h = o_g * jnp.tanh(c)
    mean = jnp.mean(h, axis=0, keepdims=True)
    var = jnp.mean((h - mean) ** 2, axis=0, keepdims=True)
    h_bn = (h - mean) / jnp.sqrt(var + 1e-5)
    return jnp.maximum(h_bn @ fc_w.T + fc_b[None, :], 0.0)


if __name__ == "__main__":
    B, T, I, H, O = 2, 8, 16, 32, 8

    key = jax.random.PRNGKey(0)
    kx, kp = jax.random.split(key)
    x = jax.random.normal(kx, (B, T, I), jnp.float32)
    params = make_params(kp, I, H, O)

    out = lstm_predictor_forward(x, params)
    out = jax.block_until_ready(out)

    ref = reference_forward(x, params)
    assert out.shape == (B, O)
    assert jnp.allclose(out, ref, atol=1e-4, rtol=1e-4)

    print("KERNEL_OK")
</pallas_src>

<mosaic_0001>
module attributes {stable_mosaic.version = 11 : i64} {
  func.func @kernel(%arg0: memref<64x16xf32, #tpu.memory_space<vmem>>, %arg1: memref<96x128xf32, #tpu.memory_space<vmem>>, %arg2: memref<8x128xf32, #tpu.memory_space<vmem>>) attributes {dimension_semantics = [], scalar_prefetch = 0 : i64, scratch_operands = 0 : i64, tpu.core_type = #tpu.core_type<tc>} {
    %c0 = arith.constant 0 : index
    %c0_0 = arith.constant 0 : index
    %0 = vector.load %arg1[%c0, %c0_0] : memref<96x128xf32, #tpu.memory_space<vmem>>, vector<16x128xf32>
    %c16 = arith.constant 16 : index
    %c0_1 = arith.constant 0 : index
    %1 = vector.load %arg1[%c16, %c0_1] : memref<96x128xf32, #tpu.memory_space<vmem>>, vector<32x128xf32>
    %c48 = arith.constant 48 : index
    %c0_2 = arith.constant 0 : index
    %2 = vector.load %arg1[%c48, %c0_2] : memref<96x128xf32, #tpu.memory_space<vmem>>, vector<1x128xf32>
    %c0_3 = arith.constant 0 : index
    %c0_4 = arith.constant 0 : index
    %3 = vector.load %arg0[%c0_3, %c0_4] : memref<64x16xf32, #tpu.memory_space<vmem>>, vector<64x16xf32>
    %cst = arith.constant dense<0.000000e+00> : vector<64x128xf32>
    %4 = tpu.matmul %3, %0, %cst {dimension_numbers = #tpu.dot_dimension_numbers<[1], [0], [0], [1], [0, 0, 1, 1], [], []>} : vector<64x16xf32>, vector<16x128xf32>, vector<64x128xf32> -> vector<64x128xf32>
    %5 = vector.broadcast %2 : vector<1x128xf32> to vector<64x128xf32>
    %6 = arith.addf %4, %5 : vector<64x128xf32>
    %cst_5 = arith.constant 0.000000e+00 : f32
    %7 = vector.broadcast %cst_5 : f32 to vector<8x32xf32>
    %cst_6 = arith.constant 0.000000e+00 : f32
    %8 = vector.broadcast %cst_6 : f32 to vector<8x32xf32>
    %9 = vector.extract_strided_slice %6 {offsets = [0, 0], sizes = [8, 128], strides = [1, 1]} : vector<64x128xf32> to vector<8x128xf32>
    %cst_7 = arith.constant dense<0.000000e+00> : vector<8x128xf32>
    %10 = tpu.matmul %7, %1, %cst_7 {dimension_numbers = #tpu.dot_dimension_numbers<[1], [0], [0], [1], [0, 0, 1, 1], [], []>} : vector<8x32xf32>, vector<32x128xf32>, vector<8x128xf32> -> vector<8x128xf32>
    %11 = arith.addf %9, %10 : vector<8x128xf32>
    %12 = vector.extract_strided_slice %11 {offsets = [0, 0], sizes = [8, 96], strides = [1, 1]} : vector<8x128xf32> to vector<8x96xf32>
    %13 = arith.negf %12 : vector<8x96xf32>
    %14 = math.exp %13 : vector<8x96xf32>
    %cst_8 = arith.constant 1.000000e+00 : f32
    %15 = vector.broadcast %cst_8 : f32 to vector<8x96xf32>
    %16 = arith.addf %15, %14 : vector<8x96xf32>
    %17 = arith.divf %15, %16 : vector<8x96xf32>
    %18 = vector.extract_strided_slice %11 {offsets = [0, 96], sizes = [8, 32], strides = [1, 1]} : vector<8x128xf32> to vector<8x32xf32>
    %19 = math.tanh %18 : vector<8x32xf32>
    %20 = vector.extract_strided_slice %17 {offsets = [0, 0], sizes = [8, 32], strides = [1, 1]} : vector<8x96xf32> to vector<8x32xf32>
    %21 = vector.extract_strided_slice %17 {offsets = [0, 32], sizes = [8, 32], strides = [1, 1]} : vector<8x96xf32> to vector<8x32xf32>
    %22 = vector.extract_strided_slice %17 {offsets = [0, 64], sizes = [8, 32], strides = [1, 1]} : vector<8x96xf32> to vector<8x32xf32>
    %23 = arith.mulf %21, %8 : vector<8x32xf32>
    %24 = arith.mulf %20, %19 : vector<8x32xf32>
    %25 = arith.addf %23, %24 : vector<8x32xf32>
    %26 = math.tanh %25 : vector<8x32xf32>
    %27 = arith.mulf %22, %26 : vector<8x32xf32>
    %28 = vector.extract_strided_slice %6 {offsets = [8, 0], sizes = [8, 128], strides = [1, 1]} : vector<64x128xf32> to vector<8x128xf32>
    %cst_9 = arith.constant dense<0.000000e+00> : vector<8x128xf32>
    %29 = tpu.matmul %27, %1, %cst_9 {dimension_numbers = #tpu.dot_dimension_numbers<[1], [0], [0], [1], [0, 0, 1, 1], [], []>} : vector<8x32xf32>, vector<32x128xf32>, vector<8x128xf32> -> vector<8x128xf32>
    %30 = arith.addf %28, %29 : vector<8x128xf32>
    %31 = vector.extract_strided_slice %30 {offsets = [0, 0], sizes = [8, 96], strides = [1, 1]} : vector<8x128xf32> to vector<8x96xf32>
    %32 = arith.negf %31 : vector<8x96xf32>
    %33 = math.exp %32 : vector<8x96xf32>
    %cst_10 = arith.constant 1.000000e+00 : f32
    %34 = vector.broadcast %cst_10 : f32 to vector<8x96xf32>
    %35 = arith.addf %34, %33 : vector<8x96xf32>
    %36 = arith.divf %34, %35 : vector<8x96xf32>
    %37 = vector.extract_strided_slice %30 {offsets = [0, 96], sizes = [8, 32], strides = [1, 1]} : vector<8x128xf32> to vector<8x32xf32>
    %38 = math.tanh %37 : vector<8x32xf32>
    %39 = vector.extract_strided_slice %36 {offsets = [0, 0], sizes = [8, 32], strides = [1, 1]} : vector<8x96xf32> to vector<8x32xf32>
    %40 = vector.extract_strided_slice %36 {offsets = [0, 32], sizes = [8, 32], strides = [1, 1]} : vector<8x96xf32> to vector<8x32xf32>
    %41 = vector.extract_strided_slice %36 {offsets = [0, 64], sizes = [8, 32], strides = [1, 1]} : vector<8x96xf32> to vector<8x32xf32>
    %42 = arith.mulf %40, %25 : vector<8x32xf32>
    %43 = arith.mulf %39, %38 : vector<8x32xf32>
    %44 = arith.addf %42, %43 : vector<8x32xf32>
    %45 = math.tanh %44 : vector<8x32xf32>
    %46 = arith.mulf %41, %45 : vector<8x32xf32>
    %47 = vector.extract_strided_slice %6 {offsets = [16, 0], sizes = [8, 128], strides = [1, 1]} : vector<64x128xf32> to vector<8x128xf32>
    %cst_11 = arith.constant dense<0.000000e+00> : vector<8x128xf32>
    %48 = tpu.matmul %46, %1, %cst_11 {dimension_numbers = #tpu.dot_dimension_numbers<[1], [0], [0], [1], [0, 0, 1, 1], [], []>} : vector<8x32xf32>, vector<32x128xf32>, vector<8x128xf32> -> vector<8x128xf32>
    %49 = arith.addf %47, %48 : vector<8x128xf32>
    %50 = vector.extract_strided_slice %49 {offsets = [0, 0], sizes = [8, 96], strides = [1, 1]} : vector<8x128xf32> to vector<8x96xf32>
    %51 = arith.negf %50 : vector<8x96xf32>
    %52 = math.exp %51 : vector<8x96xf32>
    %cst_12 = arith.constant 1.000000e+00 : f32
    %53 = vector.broadcast %cst_12 : f32 to vector<8x96xf32>
    %54 = arith.addf %53, %52 : vector<8x96xf32>
    %55 = arith.divf %53, %54 : vector<8x96xf32>
    %56 = vector.extract_strided_slice %49 {offsets = [0, 96], sizes = [8, 32], strides = [1, 1]} : vector<8x128xf32> to vector<8x32xf32>
    %57 = math.tanh %56 : vector<8x32xf32>
    %58 = vector.extract_strided_slice %55 {offsets = [0, 0], sizes = [8, 32], strides = [1, 1]} : vector<8x96xf32> to vector<8x32xf32>
    %59 = vector.extract_strided_slice %55 {offsets = [0, 32], sizes = [8, 32], strides = [1, 1]} : vector<8x96xf32> to vector<8x32xf32>
    %60 = vector.extract_strided_slice %55 {offsets = [0, 64], sizes = [8, 32], strides = [1, 1]} : vector<8x96xf32> to vector<8x32xf32>
    %61 = arith.mulf %59, %44 : vector<8x32xf32>
    %62 = arith.mulf %58, %57 : vector<8x32xf32>
    %63 = arith.addf %61, %62 : vector<8x32xf32>
    %64 = math.tanh %63 : vector<8x32xf32>
    %65 = arith.mulf %60, %64 : vector<8x32xf32>
    %66 = vector.extract_strided_slice %6 {offsets = [24, 0], sizes = [8, 128], strides = [1, 1]} : vector<64x128xf32> to vector<8x128xf32>
    %cst_13 = arith.constant dense<0.000000e+00> : vector<8x128xf32>
    %67 = tpu.matmul %65, %1, %cst_13 {dimension_numbers = #tpu.dot_dimension_numbers<[1], [0], [0], [1], [0, 0, 1, 1], [], []>} : vector<8x32xf32>, vector<32x128xf32>, vector<8x128xf32> -> vector<8x128xf32>
    %68 = arith.addf %66, %67 : vector<8x128xf32>
    %69 = vector.extract_strided_slice %68 {offsets = [0, 0], sizes = [8, 96], strides = [1, 1]} : vector<8x128xf32> to vector<8x96xf32>
    %70 = arith.negf %69 : vector<8x96xf32>
    %71 = math.exp %70 : vector<8x96xf32>
    %cst_14 = arith.constant 1.000000e+00 : f32
    %72 = vector.broadcast %cst_14 : f32 to vector<8x96xf32>
    %73 = arith.addf %72, %71 : vector<8x96xf32>
    %74 = arith.divf %72, %73 : vector<8x96xf32>
    %75 = vector.extract_strided_slice %68 {offsets = [0, 96], sizes = [8, 32], strides = [1, 1]} : vector<8x128xf32> to vector<8x32xf32>
    %76 = math.tanh %75 : vector<8x32xf32>
    %77 = vector.extract_strided_slice %74 {offsets = [0, 0], sizes = [8, 32], strides = [1, 1]} : vector<8x96xf32> to vector<8x32xf32>
    %78 = vector.extract_strided_slice %74 {offsets = [0, 32], sizes = [8, 32], strides = [1, 1]} : vector<8x96xf32> to vector<8x32xf32>
    %79 = vector.extract_strided_slice %74 {offsets = [0, 64], sizes = [8, 32], strides = [1, 1]} : vector<8x96xf32> to vector<8x32xf32>
    %80 = arith.mulf %78, %63 : vector<8x32xf32>
    %81 = arith.mulf %77, %76 : vector<8x32xf32>
    %82 = arith.addf %80, %81 : vector<8x32xf32>
    %83 = math.tanh %82 : vector<8x32xf32>
    %84 = arith.mulf %79, %83 : vector<8x32xf32>
    %85 = vector.extract_strided_slice %6 {offsets = [32, 0], sizes = [8, 128], strides = [1, 1]} : vector<64x128xf32> to vector<8x128xf32>
    %cst_15 = arith.constant dense<0.000000e+00> : vector<8x128xf32>
    %86 = tpu.matmul %84, %1, %cst_15 {dimension_numbers = #tpu.dot_dimension_numbers<[1], [0], [0], [1], [0, 0, 1, 1], [], []>} : vector<8x32xf32>, vector<32x128xf32>, vector<8x128xf32> -> vector<8x128xf32>
    %87 = arith.addf %85, %86 : vector<8x128xf32>
    %88 = vector.extract_strided_slice %87 {offsets = [0, 0], sizes = [8, 96], strides = [1, 1]} : vector<8x128xf32> to vector<8x96xf32>
    %89 = arith.negf %88 : vector<8x96xf32>
    %90 = math.exp %89 : vector<8x96xf32>
    %cst_16 = arith.constant 1.000000e+00 : f32
    %91 = vector.broadcast %cst_16 : f32 to vector<8x96xf32>
    %92 = arith.addf %91, %90 : vector<8x96xf32>
    %93 = arith.divf %91, %92 : vector<8x96xf32>
    %94 = vector.extract_strided_slice %87 {offsets = [0, 96], sizes = [8, 32], strides = [1, 1]} : vector<8x128xf32> to vector<8x32xf32>
    %95 = math.tanh %94 : vector<8x32xf32>
    %96 = vector.extract_strided_slice %93 {offsets = [0, 0], sizes = [8, 32], strides = [1, 1]} : vector<8x96xf32> to vector<8x32xf32>
    %97 = vector.extract_strided_slice %93 {offsets = [0, 32], sizes = [8, 32], strides = [1, 1]} : vector<8x96xf32> to vector<8x32xf32>
    %98 = vector.extract_strided_slice %93 {offsets = [0, 64], sizes = [8, 32], strides = [1, 1]} : vector<8x96xf32> to vector<8x32xf32>
    %99 = arith.mulf %97, %82 : vector<8x32xf32>
    %100 = arith.mulf %96, %95 : vector<8x32xf32>
    %101 = arith.addf %99, %100 : vector<8x32xf32>
    %102 = math.tanh %101 : vector<8x32xf32>
    %103 = arith.mulf %98, %102 : vector<8x32xf32>
    %104 = vector.extract_strided_slice %6 {offsets = [40, 0], sizes = [8, 128], strides = [1, 1]} : vector<64x128xf32> to vector<8x128xf32>
    %cst_17 = arith.constant dense<0.000000e+00> : vector<8x128xf32>
    %105 = tpu.matmul %103, %1, %cst_17 {dimension_numbers = #tpu.dot_dimension_numbers<[1], [0], [0], [1], [0, 0, 1, 1], [], []>} : vector<8x32xf32>, vector<32x128xf32>, vector<8x128xf32> -> vector<8x128xf32>
    %106 = arith.addf %104, %105 : vector<8x128xf32>
    %107 = vector.extract_strided_slice %106 {offsets = [0, 0], sizes = [8, 96], strides = [1, 1]} : vector<8x128xf32> to vector<8x96xf32>
    %108 = arith.negf %107 : vector<8x96xf32>
    %109 = math.exp %108 : vector<8x96xf32>
    %cst_18 = arith.constant 1.000000e+00 : f32
    %110 = vector.broadcast %cst_18 : f32 to vector<8x96xf32>
    %111 = arith.addf %110, %109 : vector<8x96xf32>
    %112 = arith.divf %110, %111 : vector<8x96xf32>
    %113 = vector.extract_strided_slice %106 {offsets = [0, 96], sizes = [8, 32], strides = [1, 1]} : vector<8x128xf32> to vector<8x32xf32>
    %114 = math.tanh %113 : vector<8x32xf32>
    %115 = vector.extract_strided_slice %112 {offsets = [0, 0], sizes = [8, 32], strides = [1, 1]} : vector<8x96xf32> to vector<8x32xf32>
    %116 = vector.extract_strided_slice %112 {offsets = [0, 32], sizes = [8, 32], strides = [1, 1]} : vector<8x96xf32> to vector<8x32xf32>
    %117 = vector.extract_strided_slice %112 {offsets = [0, 64], sizes = [8, 32], strides = [1, 1]} : vector<8x96xf32> to vector<8x32xf32>
    %118 = arith.mulf %116, %101 : vector<8x32xf32>
    %119 = arith.mulf %115, %114 : vector<8x32xf32>
    %120 = arith.addf %118, %119 : vector<8x32xf32>
    %121 = math.tanh %120 : vector<8x32xf32>
    %122 = arith.mulf %117, %121 : vector<8x32xf32>
    %123 = vector.extract_strided_slice %6 {offsets = [48, 0], sizes = [8, 128], strides = [1, 1]} : vector<64x128xf32> to vector<8x128xf32>
    %cst_19 = arith.constant dense<0.000000e+00> : vector<8x128xf32>
    %124 = tpu.matmul %122, %1, %cst_19 {dimension_numbers = #tpu.dot_dimension_numbers<[1], [0], [0], [1], [0, 0, 1, 1], [], []>} : vector<8x32xf32>, vector<32x128xf32>, vector<8x128xf32> -> vector<8x128xf32>
    %125 = arith.addf %123, %124 : vector<8x128xf32>
    %126 = vector.extract_strided_slice %125 {offsets = [0, 0], sizes = [8, 96], strides = [1, 1]} : vector<8x128xf32> to vector<8x96xf32>
    %127 = arith.negf %126 : vector<8x96xf32>
    %128 = math.exp %127 : vector<8x96xf32>
    %cst_20 = arith.constant 1.000000e+00 : f32
    %129 = vector.broadcast %cst_20 : f32 to vector<8x96xf32>
    %130 = arith.addf %129, %128 : vector<8x96xf32>
    %131 = arith.divf %129, %130 : vector<8x96xf32>
    %132 = vector.extract_strided_slice %125 {offsets = [0, 96], sizes = [8, 32], strides = [1, 1]} : vector<8x128xf32> to vector<8x32xf32>
    %133 = math.tanh %132 : vector<8x32xf32>
    %134 = vector.extract_strided_slice %131 {offsets = [0, 0], sizes = [8, 32], strides = [1, 1]} : vector<8x96xf32> to vector<8x32xf32>
    %135 = vector.extract_strided_slice %131 {offsets = [0, 32], sizes = [8, 32], strides = [1, 1]} : vector<8x96xf32> to vector<8x32xf32>
    %136 = vector.extract_strided_slice %131 {offsets = [0, 64], sizes = [8, 32], strides = [1, 1]} : vector<8x96xf32> to vector<8x32xf32>
    %137 = arith.mulf %135, %120 : vector<8x32xf32>
    %138 = arith.mulf %134, %133 : vector<8x32xf32>
    %139 = arith.addf %137, %138 : vector<8x32xf32>
    %140 = math.tanh %139 : vector<8x32xf32>
    %141 = arith.mulf %136, %140 : vector<8x32xf32>
    %142 = vector.extract_strided_slice %6 {offsets = [56, 0], sizes = [8, 128], strides = [1, 1]} : vector<64x128xf32> to vector<8x128xf32>
    %cst_21 = arith.constant dense<0.000000e+00> : vector<8x128xf32>
    %143 = tpu.matmul %141, %1, %cst_21 {dimension_numbers = #tpu.dot_dimension_numbers<[1], [0], [0], [1], [0, 0, 1, 1], [], []>} : vector<8x32xf32>, vector<32x128xf32>, vector<8x128xf32> -> vector<8x128xf32>
    %144 = arith.addf %142, %143 : vector<8x128xf32>
    %145 = vector.extract_strided_slice %144 {offsets = [0, 0], sizes = [8, 96], strides = [1, 1]} : vector<8x128xf32> to vector<8x96xf32>
    %146 = arith.negf %145 : vector<8x96xf32>
    %147 = math.exp %146 : vector<8x96xf32>
    %cst_22 = arith.constant 1.000000e+00 : f32
    %148 = vector.broadcast %cst_22 : f32 to vector<8x96xf32>
    %149 = arith.addf %148, %147 : vector<8x96xf32>
    %150 = arith.divf %148, %149 : vector<8x96xf32>
    %151 = vector.extract_strided_slice %144 {offsets = [0, 96], sizes = [8, 32], strides = [1, 1]} : vector<8x128xf32> to vector<8x32xf32>
    %152 = math.tanh %151 : vector<8x32xf32>
    %153 = vector.extract_strided_slice %150 {offsets = [0, 0], sizes = [8, 32], strides = [1, 1]} : vector<8x96xf32> to vector<8x32xf32>
    %154 = vector.extract_strided_slice %150 {offsets = [0, 32], sizes = [8, 32], strides = [1, 1]} : vector<8x96xf32> to vector<8x32xf32>
    %155 = vector.extract_strided_slice %150 {offsets = [0, 64], sizes = [8, 32], strides = [1, 1]} : vector<8x96xf32> to vector<8x32xf32>
    %156 = arith.mulf %154, %139 : vector<8x32xf32>
    %157 = arith.mulf %153, %152 : vector<8x32xf32>
    %158 = arith.addf %156, %157 : vector<8x32xf32>
    %159 = math.tanh %158 : vector<8x32xf32>
    %160 = arith.mulf %155, %159 : vector<8x32xf32>
    %161 = tpu.iota {dimensions = array<i32: 0>} : vector<8x32xi32>
    %c2_i32 = arith.constant 2 : i32
    %162 = vector.broadcast %c2_i32 : i32 to vector<8x32xi32>
    %163 = arith.cmpi slt, %161, %162 : vector<8x32xi32>
    %164 = arith.extui %163 : vector<8x32xi1> to vector<8x32xi32>
    %165 = arith.sitofp %164 : vector<8x32xi32> to vector<8x32xf32>
    %166 = arith.mulf %160, %165 : vector<8x32xf32>
    %cst_23 = arith.constant dense<0.000000e+00> : vector<32xf32>
    %167 = vector.multi_reduction <add>, %166, %cst_23 [0] : vector<8x32xf32> to vector<32xf32>
    %168 = vector.shape_cast %167 : vector<32xf32> to vector<1x32xf32>
    %cst_24 = arith.constant 5.000000e-01 : f32
    %169 = vector.broadcast %cst_24 : f32 to vector<1x32xf32>
    %170 = arith.mulf %168, %169 : vector<1x32xf32>
    %171 = vector.broadcast %170 : vector<1x32xf32> to vector<8x32xf32>
    %172 = arith.subf %160, %171 : vector<8x32xf32>
    %173 = arith.mulf %172, %165 : vector<8x32xf32>
    %174 = arith.mulf %173, %173 : vector<8x32xf32>
    %cst_25 = arith.constant dense<0.000000e+00> : vector<32xf32>
    %175 = vector.multi_reduction <add>, %174, %cst_25 [0] : vector<8x32xf32> to vector<32xf32>
    %176 = vector.shape_cast %175 : vector<32xf32> to vector<1x32xf32>
    %cst_26 = arith.constant 5.000000e-01 : f32
    %177 = vector.broadcast %cst_26 : f32 to vector<1x32xf32>
    %178 = arith.mulf %176, %177 : vector<1x32xf32>
    %179 = vector.broadcast %170 : vector<1x32xf32> to vector<8x32xf32>
    %180 = arith.subf %160, %179 : vector<8x32xf32>
    %cst_27 = arith.constant 9.99999974E-6 : f32
    %181 = vector.broadcast %cst_27 : f32 to vector<1x32xf32>
    %182 = arith.addf %178, %181 : vector<1x32xf32>
    %183 = math.rsqrt %182 : vector<1x32xf32>
    %184 = vector.broadcast %183 : vector<1x32xf32> to vector<8x32xf32>
    %185 = arith.mulf %180, %184 : vector<8x32xf32>
    %c56 = arith.constant 56 : index
    %c0_28 = arith.constant 0 : index
    %186 = vector.load %arg1[%c56, %c0_28] : memref<96x128xf32, #tpu.memory_space<vmem>>, vector<32x128xf32>
    %c88 = arith.constant 88 : index
    %c0_29 = arith.constant 0 : index
    %187 = vector.load %arg1[%c88, %c0_29] : memref<96x128xf32, #tpu.memory_space<vmem>>, vector<1x128xf32>
    %cst_30 = arith.constant dense<0.000000e+00> : vector<8x128xf32>
    %188 = tpu.matmul %185, %186, %cst_30 {dimension_numbers = #tpu.dot_dimension_numbers<[1], [0], [0], [1], [0, 0, 1, 1], [], []>} : vector<8x32xf32>, vector<32x128xf32>, vector<8x128xf32> -> vector<8x128xf32>
    %189 = vector.broadcast %187 : vector<1x128xf32> to vector<8x128xf32>
    %190 = arith.addf %188, %189 : vector<8x128xf32>
    %cst_31 = arith.constant 0.000000e+00 : f32
    %191 = vector.broadcast %cst_31 : f32 to vector<8x128xf32>
    %192 = arith.maximumf %190, %191 : vector<8x128xf32>
    %c0_32 = arith.constant 0 : index
    %c0_33 = arith.constant 0 : index
    %193 = vector.load %arg2[%c0_32, %c0_33] : memref<8x128xf32, #tpu.memory_space<vmem>>, vector<8x128xf32>
    tpu.vector_store %arg2[%c0_32, %c0_33], %192 {strides = array<i32>} : memref<8x128xf32, #tpu.memory_space<vmem>>, vector<8x128xf32>,
    return
  }
}

</mosaic_0001>

<bundles_post_ra>
// kernel: tpu_custom_call.1
= control target key start
LH: loop header
LB: loop body
LE: loop exit
PB: predicated region body
PF: predicated region fallthrough
CT: control target
= control target key end

     0   :  { %7 = vsyncpa [#allocation3], 0  ;;  %s1682_s0 = inlined_call_operand.vmem [shape: f32[64,16], index: 0, kind: input, shape index: {}]   ;;  %s1683_s1 = inlined_call_operand.hbm [shape: f32[96,128], index: 1, kind: input, shape index: {}]   ;;  %s1684_s2 = inlined_call_operand.hbm [shape: f32[8,128], index: 2, kind: output, shape index: {}]  }
   0x1   :  { %8 = vsyncpa [#allocation4], 0  ;;  %s1482_s9 = smov [#allocation2]   ;;  %s1434_s13 = scalar_lea.hbm %s1683_s1, 1536 }
   0x2   :  { %s16_s10 = sshll.u32 %s1482_s9, 4  ;;  %p1435_p0 = scmp.ne.s32.totalorder %s1683_s1, %s1434_s13  ;;  %s17_s10 = int_to_ptr.vmem [resolvable:$true] %s16_s10 }
   0x3   :  { %p1438_p1 = scmp.lt.u32.totalorder %s1434_s13, %s1683_s1 }
   0x5   :  { %p1440_p2 = pnand %p1438_p1, %p1435_p0 }
   0x7   :  { %1443 = shalt.err (!%p1440_p2)
}
   0x8   :  { %s1444_s18 = scalar_lea.vmem %s17_s10, 1536  ;;  %p1449_p4 = scmp.lt.s32.totalorder %s17_s10, %s17_s10 }
   0x9   :  { %p1445_p3 = scmp.ne.s32.totalorder %s17_s10, %s1444_s18  ;;  %p1450_p5 = scmp.lt.s32.totalorder %s1444_s18, %s1444_s18 }
   0xb   :  { %p1451_p6 = por %p1450_p5, %p1449_p4 }
   0xd   :  { %p1452_p7 = pnand %p1451_p6, %p1445_p3 }
   0xf   :  { %1455 = shalt.err (!%p1452_p7)
}
  0x10   :  { %s1483_s19 = smov 128   ;;  %s1484_s20 = smov 8  }
  0x11   :  { %22 = dma.hbm_to_vmem [thread:$0]  %s1683_s1, 1536, %s17_s10, [#allocation3], %s1483_s19, %s1483_s19, %s1484_s20  }
  0x12   :  { %1478 = dma.done.wait [#allocation3], 1536  }
  0x13   :  { %1479 = vsyncadd [#allocation3], 4294965760  ;;  %v1485_v0 = vmov 0.0|0.0   ;;  %vm1486_vm0 = vmmov 0   ;;  %v1487_v1 = vmov 0.0   ;;  %vm45_vm1 = vcmask 130048  }
  0x14   :  { %1305 = vmatprep.subr.bf16.mxu1 %v1485_v0  ;;  %1210 = vmatprep.mubr.msk.f32.mxu1 %vm1486_vm0, %v1487_v1  ;;  %v26_v2 = vld [vmem:[#allocation2] sm:$0xff]  ;;  %v27_v3 = vld [vmem:[#allocation2 + $0x8] sm:$0xff]  ;;  %v28_v4 = vld [vmem:[#allocation2 + $0x10] sm:$0xff]  ;;  %s1488_s26 = smov 32   ;;  %s1489_s27 = smov 64   ;;  %vm175_vm2 = vcmask 261120  }
  0x15   :  { %v1301_v5 = vpack.c.bf16 %v27_v3, %v26_v2  ;;  %v29_v6 = vld [vmem:[#allocation2 + $0x18] sm:$0xff]  ;;  %v33_v7 = vld [vmem:[%s1682_s0] sm:$0xff]  ;;  %v31_v10 = vld [vmem:[#allocation2 + $0x28] sm:$0xff]  ;;  %vm980_vm4 = vcmask 785920  }
  0x16   :  { %v1524_v8 = vpack.c.bf16 %v29_v6, %v28_v4  ;;  %1190 = vmatprep.mubr.msk.f32.mxu0 %vm45_vm1, %v33_v7  ;;  %v30_v9 = vld [vmem:[#allocation2 + $0x20] sm:$0xff]  ;;  %v34_v11 = vld [vmem:[%s1682_s0 + $0x8] sm:$0xff]  ;;  %v1549_v13 = vld [vmem:[#allocation2 + $0x30] ss:$0 sm:$0xff] }
  0x17   :  { %1302 = vmatprep.subr.bf16.mxu0 %v1301_v5  ;;  %v1531_v12 = vpack.c.bf16 %v31_v10, %v30_v9  ;;  %v35_v48 = vld [vmem:[%s1682_s0 + $0x10] sm:$0xff]  ;;  %v36_v49 = vld [vmem:[%s1682_s0 + $0x18] sm:$0xff]  ;;  %v37_v50 = vld [vmem:[%s1682_s0 + $0x20] sm:$0xff] }
  0x18   :  { %1307 = vmatpush3.bf16.msra.mxu1 %v1524_v8  ;;  %1304 = vmatpush3.bf16.msra.mxu0 %v1301_v5  ;;  %v38_v51 = vld [vmem:[%s1682_s0 + $0x28] sm:$0xff]  ;;  %v39_v52 = vld [vmem:[%s1682_s0 + $0x30] sm:$0xff]  ;;  %v40_v53 = vld [vmem:[%s1682_s0 + $0x38] sm:$0xff]  ;;  %s1490_s0 = smov [#allocation5]  }
  0x19   :  { %1308 = vmatprep.subr.bf16.mxu1 %v1485_v0  ;;  %1317 = vmatprep.subr.bf16.mxu0 %v1485_v0  ;;  %s1095_s12 = sshll.u32 %s1490_s0, 4  ;;  %s1096_s12 = int_to_ptr.vmem [resolvable:$true] %s1095_s12 }
  0x1a   :  { %s1456_s13 = scalar_lea.vmem %s1096_s12, 128  ;;  %p1461_p9 = scmp.lt.s32.totalorder %s1096_s12, %s1096_s12 }
  0x1b   :  { %1191 = vmatmul.mubr.msk.f32.vlgmr.msra.gmra.mrb[0].mxu0 %vm45_vm1, %v34_v11  ;;  %p1457_p8 = scmp.ne.s32.totalorder %s1096_s12, %s1456_s13  ;;  %p1462_p10 = scmp.lt.s32.totalorder %s1456_s13, %s1456_s13 }
  0x1c   :  { %1310 = vmatpush3.bf16.msra.mxu1 %v1531_v12  ;;  %1319 = vmatpush3.bf16.msra.mxu0 %v1524_v8 }
  0x1d   :  { %1311 = vmatprep.subr.bf16.mxu1 %v1485_v0  ;;  %1320 = vmatprep.subr.bf16.mxu0 %v1485_v0  ;;  %p1463_p11 = por %p1462_p10, %p1461_p9 }
  0x1e   :  { %1193 = vmatprep.mubr.msk.f32.mxu0 %vm45_vm1, %v35_v48 }
  0x1f   :  { %1211 = vmatmul.mubr.f32.vlgmr.msra.gmra.mrb[0].mxu1 %v1487_v1  ;;  %1194 = vmatmul.mubr.msk.f32.gmra.mrb[2].mxu0 %vm45_vm1, %v36_v49  ;;  %p1464_p12 = pnand %p1463_p11, %p1457_p8 }
  0x20   :  { %1313 = vmatpush3.bf16.msra.mxu1 %v1524_v8  ;;  %1221 = vmatprep.mubr.msk.f32.mxu1 %vm1486_vm0, %v1487_v1 }
  0x21   :  { %1314 = vmatprep.subr.bf16.mxu1 %v1485_v0  ;;  %1322 = vmatpush3.bf16.msra.mxu0 %v1531_v12 }
  0x22   :  { %1329 = vmatprep.subr.bf16.mxu0 %v1485_v0  ;;  %1196 = vmatprep.mubr.msk.f32.mxu0 %vm45_vm1, %v37_v50 }
  0x23   :  { %1197 = vmatmul.mubr.msk.f32.gmra.mrb[4].mxu0 %vm45_vm1, %v38_v51 }
  0x24   :  { %1316 = vmatpush3.bf16.msra.mxu1 %v1531_v12  ;;  %1199 = vmatprep.mubr.msk.f32.mxu0 %vm45_vm1, %v39_v52 }
  0x25   :  { %1323 = vmatprep.subr.bf16.mxu1 %v1485_v0 }
  0x27   :  { %1200 = vmatmul.mubr.msk.f32.gmra.mrb[6].mxu0 %vm45_vm1, %v40_v53 }
  0x28   :  { %1232 = vmatprep.mubr.msk.f32.mxu0 %vm1486_vm0, %v1487_v1 }
  0xee   :  { %v1192_v14 = vpop.f32.mrb[0].mxu0 }
  0xef   :  { %v136_v15 = vpop.f32.mrb[1].mxu0  ;;  %v142_v34 = vadd.f32 %v1192_v14, %v1549_v13 }
  0xf0   :  { %v137_v16 = vadd.f32 %v1549_v13, %v136_v15 }
  0xf2   :  { %v245_v17 = vpop.f32.mrb[0].mxu1  ;;  %v1195_v57 = vpop.f32.mrb[2].mxu0 }
  0xf3   :  { %v249_v18 = vadd.f32 %v245_v17, %v137_v16  ;;  %v1212_v19 = vpop.f32.mrb[1].mxu1  ;;  %v146_v58 = vpop.f32.mrb[3].mxu0 }
  0xf4   :  { %v147_v2 = vadd.f32 %v1549_v13, %v146_v58 }
  0xf5   :  { %1368 = vtanh.f32 %v249_v18  ;;  %v1113_v21 = vmul.f32 -1.442695, %v249_v18 }
  0xf6   :  { %v1594_v59 = vpop.f32.mrb[4].mxu0 }
  0xf7   :  { %1370 = vpow2.f32 %v1113_v21  ;;  %v1596_v60 = vpop.f32.mrb[5].mxu0 }
  0xfa   :  { %v1598_v61 = vpop.f32.mrb[6].mxu0 }
  0xfb   :  { %v1600_v62 = vpop.f32.mrb[7].mxu0 }
  0xff   :  { %v1369_v20 = vpop.eup %1368 }
 0x100   :  { %259 = vrot.lane.b32.xlu0 %v1369_v20, %s1488_s26 }
 0x101   :  { %v1371_v22 = vpop.eup %1370 }
 0x102   :  { %v253_v23 = vadd.f32 1.0, %v1371_v22 }
 0x104   :  { %1372 = vrcp.f32 %v253_v23  ;;  %v152_v23 = vadd.f32 %v1195_v57, %v1549_v13 }
 0x10e   :  { %v1373_v24 = vpop.eup %1372 }
 0x10f   :  { %v257_v27 = vmul.f32 0.0, %v1373_v24 }
 0x172   :  { %v260_v25 = vpop.permute.xlu0 %259 }
 0x173   :  { %v262_v26 = vmul.f32 %v1373_v24, %v260_v25 }
 0x175   :  { %264 = vrot.lane.b32.xlu0 %v262_v26, %s1488_s26 }
 0x1e7   :  { %v265_v28 = vpop.permute.xlu0 %264 }
 0x1e8   :  { %v267_v29 = vadd.f32 %v265_v28, %v257_v27 }
 0x1ea   :  { %1374 = vtanh.f32 %v267_v29 }
 0x1f4   :  { %v1375_v30 = vpop.eup %1374 }
 0x1f5   :  { %270 = vrot.lane.b32.xlu1 %v1375_v30, %s1488_s26 }
 0x267   :  { %v271_v31 = vpop.permute.xlu1 %270 }
 0x268   :  { %v273_v32 = vmul.f32 %v1373_v24, %v271_v31 }
 0x26a   :  { %275 = vrot.lane.b32.xlu1 %v273_v32, %s1489_s27 }
 0x2dc   :  { %v276_v33 = vpop.permute.xlu1 %275 }
 0x2dd   :  { %1222 = vmatmul.mubr.msk.f32.vlgmr.msra.gmra.mrb[2].mxu1 %vm175_vm2, %v276_v33 }
 0x2de   :  { %1325 = vmatpush3.bf16.msra.mxu1 %v1524_v8  ;;  %1243 = vmatprep.mubr.msk.f32.mxu1 %vm1486_vm0, %v1487_v1 }
 0x2df   :  { %1326 = vmatprep.subr.bf16.mxu1 %v1485_v0 }
 0x2e2   :  { %1328 = vmatpush3.bf16.msra.mxu1 %v1531_v12 }
 0x2e3   :  { %1335 = vmatprep.subr.bf16.mxu1 %v1485_v0 }
 0x3b0   :  { %v345_v35 = vpop.f32.mrb[2].mxu1 }
 0x3b1   :  { %v349_v36 = vadd.f32 %v345_v35, %v142_v34  ;;  %v1223_v37 = vpop.f32.mrb[3].mxu1 }
 0x3b3   :  { %1376 = vtanh.f32 %v349_v36  ;;  %v1115_v39 = vmul.f32 -1.442695, %v349_v36 }
 0x3b5   :  { %1378 = vpow2.f32 %v1115_v39 }
 0x3bd   :  { %v1377_v38 = vpop.eup %1376 }
 0x3be   :  { %359 = vrot.lane.b32.xlu0 %v1377_v38, %s1488_s26 }
 0x3bf   :  { %v1379_v40 = vpop.eup %1378 }
 0x3c0   :  { %v353_v41 = vadd.f32 1.0, %v1379_v40 }
 0x3c2   :  { %1380 = vrcp.f32 %v353_v41  ;;  %v157_v41 = vadd.f32 %v1549_v13, %v1596_v60  ;;  %v162_v60 = vadd.f32 %v1594_v59, %v1549_v13 }
 0x3cc   :  { %v1381_v42 = vpop.eup %1380 }
 0x3cd   :  { %v357_v45 = vmul.f32 %v1381_v42, %v267_v29 }
 0x430   :  { %v360_v43 = vpop.permute.xlu0 %359 }
 0x431   :  { %v362_v44 = vmul.f32 %v1381_v42, %v360_v43 }
 0x433   :  { %364 = vrot.lane.b32.xlu1 %v362_v44, %s1488_s26 }
 0x4a5   :  { %v365_v46 = vpop.permute.xlu1 %364 }
 0x4a6   :  { %v367_v47 = vadd.f32 %v365_v46, %v357_v45 }
 0x4a8   :  { %1382 = vtanh.f32 %v367_v47 }
 0x4b2   :  { %v1383_v54 = vpop.eup %1382 }
 0x4b3   :  { %370 = vrot.lane.b32.xlu0 %v1383_v54, %s1488_s26 }
 0x525   :  { %v371_v55 = vpop.permute.xlu0 %370 }
 0x526   :  { %v373_v56 = vmul.f32 %v1381_v42, %v371_v55 }
 0x528   :  { %375 = vrot.lane.b32.xlu1 %v373_v56, %s1489_s27 }
 0x59a   :  { %v376_v63 = vpop.permute.xlu1 %375 }
 0x59b   :  { %1233 = vmatmul.mubr.msk.f32.vlgmr.msra.gmra.mrb[8].mxu0 %vm175_vm2, %v376_v63 }
 0x59c   :  { %1331 = vmatpush3.bf16.msra.mxu0 %v1524_v8  ;;  %1254 = vmatprep.mubr.msk.f32.mxu0 %vm1486_vm0, %v1487_v1 }
 0x59d   :  { %1332 = vmatprep.subr.bf16.mxu0 %v1485_v0 }
 0x5a0   :  { %1334 = vmatpush3.bf16.msra.mxu0 %v1531_v12 }
 0x5a1   :  { %1341 = vmatprep.subr.bf16.mxu0 %v1485_v0 }
 0x66e   :  { %v445_v3 = vpop.f32.mrb[8].mxu0 }
 0x66f   :  { %v449_v4 = vadd.f32 %v445_v3, %v147_v2  ;;  %v1234_v5 = vpop.f32.mrb[9].mxu0 }
 0x671   :  { %1384 = vtanh.f32 %v449_v4  ;;  %v1117_v7 = vmul.f32 -1.442695, %v449_v4 }
 0x673   :  { %1386 = vpow2.f32 %v1117_v7 }
 0x67b   :  { %v1385_v6 = vpop.eup %1384 }
 0x67c   :  { %459 = vrot.lane.b32.xlu0 %v1385_v6, %s1488_s26 }
 0x67d   :  { %v1387_v9 = vpop.eup %1386 }
 0x67e   :  { %v453_v10 = vadd.f32 1.0, %v1387_v9 }
 0x680   :  { %1388 = vrcp.f32 %v453_v10 }
 0x68a   :  { %v1389_v11 = vpop.eup %1388 }
 0x68b   :  { %v457_v16 = vmul.f32 %v1389_v11, %v367_v47 }
 0x6ee   :  { %v460_v14 = vpop.permute.xlu0 %459 }
 0x6ef   :  { %v462_v15 = vmul.f32 %v1389_v11, %v460_v14 }
 0x6f1   :  { %464 = vrot.lane.b32.xlu1 %v462_v15, %s1488_s26 }
 0x763   :  { %v465_v17 = vpop.permute.xlu1 %464 }
 0x764   :  { %v467_v18 = vadd.f32 %v465_v17, %v457_v16 }
 0x766   :  { %1390 = vtanh.f32 %v467_v18 }
 0x770   :  { %v1391_v19 = vpop.eup %1390 }
 0x771   :  { %470 = vrot.lane.b32.xlu0 %v1391_v19, %s1488_s26 }
 0x7e3   :  { %v471_v20 = vpop.permute.xlu0 %470 }
 0x7e4   :  { %v473_v21 = vmul.f32 %v1389_v11, %v471_v20 }
 0x7e6   :  { %475 = vrot.lane.b32.xlu1 %v473_v21, %s1489_s27 }
 0x858   :  { %v476_v22 = vpop.permute.xlu1 %475 }
 0x859   :  { %1244 = vmatmul.mubr.msk.f32.vlgmr.msra.gmra.mrb[4].mxu1 %vm175_vm2, %v476_v22 }
 0x85a   :  { %1337 = vmatpush3.bf16.msra.mxu1 %v1524_v8  ;;  %1265 = vmatprep.mubr.msk.f32.mxu1 %vm1486_vm0, %v1487_v1 }
 0x85b   :  { %1338 = vmatprep.subr.bf16.mxu1 %v1485_v0 }
 0x85e   :  { %1340 = vmatpush3.bf16.msra.mxu1 %v1531_v12 }
 0x85f   :  { %1347 = vmatprep.subr.bf16.mxu1 %v1485_v0 }
 0x92c   :  { %v545_v24 = vpop.f32.mrb[4].mxu1 }
 0x92d   :  { %v549_v25 = vadd.f32 %v545_v24, %v152_v23  ;;  %v1245_v26 = vpop.f32.mrb[5].mxu1 }
 0x92f   :  { %1392 = vtanh.f32 %v549_v25  ;;  %v1119_v28 = vmul.f32 -1.442695, %v549_v25 }
 0x931   :  { %1394 = vpow2.f32 %v1119_v28 }
 0x939   :  { %v1393_v27 = vpop.eup %1392 }
 0x93a   :  { %559 = vrot.lane.b32.xlu0 %v1393_v27, %s1488_s26 }
 0x93b   :  { %v1395_v29 = vpop.eup %1394 }
 0x93c   :  { %v553_v30 = vadd.f32 1.0, %v1395_v29 }
 0x93e   :  { %1396 = vrcp.f32 %v553_v30 }
 0x948   :  { %v1397_v31 = vpop.eup %1396 }
 0x949   :  { %v557_v34 = vmul.f32 %v1397_v31, %v467_v18  ;;  %v167_v18 = vadd.f32 %v1549_v13, %v1600_v62 }
 0x9ac   :  { %v560_v32 = vpop.permute.xlu0 %559 }
 0x9ad   :  { %v562_v33 = vmul.f32 %v1397_v31, %v560_v32 }
 0x9af   :  { %564 = vrot.lane.b32.xlu1 %v562_v33, %s1488_s26 }
 0xa21   :  { %v565_v35 = vpop.permute.xlu1 %564 }
 0xa22   :  { %v567_v36 = vadd.f32 %v565_v35, %v557_v34  ;;  %v172_v35 = vadd.f32 %v1598_v61, %v1549_v13 }
 0xa24   :  { %1398 = vtanh.f32 %v567_v36 }
 0xa2e   :  { %v1399_v37 = vpop.eup %1398 }
 0xa2f   :  { %570 = vrot.lane.b32.xlu0 %v1399_v37, %s1488_s26 }
 0xaa1   :  { %v571_v38 = vpop.permute.xlu0 %570 }
 0xaa2   :  { %v573_v39 = vmul.f32 %v1397_v31, %v571_v38 }
 0xaa4   :  { %575 = vrot.lane.b32.xlu1 %v573_v39, %s1489_s27 }
 0xb16   :  { %v576_v40 = vpop.permute.xlu1 %575 }
 0xb17   :  { %1255 = vmatmul.mubr.msk.f32.vlgmr.msra.gmra.mrb[10].mxu0 %vm175_vm2, %v576_v40 }
 0xb18   :  { %1343 = vmatpush3.bf16.msra.mxu0 %v1524_v8  ;;  %1276 = vmatprep.mubr.msk.f32.mxu0 %vm1486_vm0, %v1487_v1 }
 0xb19   :  { %1344 = vmatprep.subr.bf16.mxu0 %v1485_v0 }
 0xb1c   :  { %1346 = vmatpush3.bf16.msra.mxu0 %v1531_v12 }
 0xb1d   :  { %1353 = vmatprep.subr.bf16.mxu0 %v1485_v0 }
 0xbea   :  { %v645_v42 = vpop.f32.mrb[10].mxu0 }
 0xbeb   :  { %v649_v43 = vadd.f32 %v645_v42, %v157_v41  ;;  %v1256_v44 = vpop.f32.mrb[11].mxu0 }
 0xbed   :  { %1400 = vtanh.f32 %v649_v43  ;;  %v1121_v46 = vmul.f32 -1.442695, %v649_v43 }
 0xbef   :  { %1402 = vpow2.f32 %v1121_v46 }
 0xbf7   :  { %v1401_v45 = vpop.eup %1400 }
 0xbf8   :  { %659 = vrot.lane.b32.xlu0 %v1401_v45, %s1488_s26 }
 0xbf9   :  { %v1403_v47 = vpop.eup %1402 }
 0xbfa   :  { %v653_v48 = vadd.f32 1.0, %v1403_v47 }
 0xbfc   :  { %1404 = vrcp.f32 %v653_v48  ;;  %v1003_v48 = vld [vmem:[#allocation2 + $0x38] sm:$0xff] }
 0xc06   :  { %v1405_v49 = vpop.eup %1404 }
 0xc07   :  { %v657_v52 = vmul.f32 %v1405_v49, %v567_v36 }
 0xc6a   :  { %v660_v50 = vpop.permute.xlu0 %659 }
 0xc6b   :  { %v662_v51 = vmul.f32 %v1405_v49, %v660_v50  ;;  %v1005_v50 = vld [vmem:[#allocation2 + $0x48] sm:$0xff] }
 0xc6d   :  { %664 = vrot.lane.b32.xlu1 %v662_v51, %s1488_s26 }
 0xcdf   :  { %v665_v53 = vpop.permute.xlu1 %664 }
 0xce0   :  { %v667_v54 = vadd.f32 %v665_v53, %v657_v52  ;;  %v1006_v52 = vld [vmem:[#allocation2 + $0x50] sm:$0xff] }
 0xce1   :  { %v1357_v53 = vpack.c.bf16 %v1006_v52, %v1005_v50 }
 0xce2   :  { %1406 = vtanh.f32 %v667_v54 }
 0xcec   :  { %v1407_v55 = vpop.eup %1406 }
 0xced   :  { %670 = vrot.lane.b32.xlu0 %v1407_v55, %s1488_s26 }
 0xd5f   :  { %v671_v56 = vpop.permute.xlu0 %670 }
 0xd60   :  { %v673_v57 = vmul.f32 %v1405_v49, %v671_v56  ;;  %v1004_v49 = vld [vmem:[#allocation2 + $0x40] sm:$0xff] }
 0xd61   :  { %v1354_v51 = vpack.c.bf16 %v1004_v49, %v1003_v48 }
 0xd62   :  { %675 = vrot.lane.b32.xlu1 %v673_v57, %s1489_s27 }
 0xdd4   :  { %v676_v58 = vpop.permute.xlu1 %675 }
 0xdd5   :  { %1266 = vmatmul.mubr.msk.f32.vlgmr.msra.gmra.mrb[6].mxu1 %vm175_vm2, %v676_v58 }
 0xdd6   :  { %1349 = vmatpush3.bf16.msra.mxu1 %v1524_v8  ;;  %1287 = vmatprep.mubr.msk.f32.mxu1 %vm1486_vm0, %v1487_v1 }
 0xdd7   :  { %1350 = vmatprep.subr.bf16.mxu1 %v1485_v0 }
 0xdda   :  { %1352 = vmatpush3.bf16.msra.mxu1 %v1531_v12 }
 0xea8   :  { %v745_v63 = vpop.f32.mrb[6].mxu1 }
 0xea9   :  { %v749_v2 = vadd.f32 %v745_v63, %v162_v60  ;;  %v1267_v3 = vpop.f32.mrb[7].mxu1 }
 0xeab   :  { %1408 = vtanh.f32 %v749_v2  ;;  %v1123_v5 = vmul.f32 -1.442695, %v749_v2 }
 0xead   :  { %1410 = vpow2.f32 %v1123_v5 }
 0xeb5   :  { %v1409_v4 = vpop.eup %1408 }
 0xeb6   :  { %759 = vrot.lane.b32.xlu0 %v1409_v4, %s1488_s26 }
 0xeb7   :  { %v1411_v8 = vpop.eup %1410 }
 0xeb8   :  { %v753_v6 = vadd.f32 1.0, %v1411_v8 }
 0xeba   :  { %1412 = vrcp.f32 %v753_v6 }
 0xec4   :  { %v1413_v7 = vpop.eup %1412 }
 0xec5   :  { %v757_v12 = vmul.f32 %v1413_v7, %v667_v54  ;;  %v974_v54 = vlaneseq }
 0xec7   :  { %v975_v55 = vshrl.u32 %v974_v54, 7 }
 0xec9   :  { %vm976_vm3 = vcmp.lt.s32.totalorder %v975_v55, 2 }
 0xeca   :  { %v1128_v56 = vsel %vm976_vm3, 1.0, %v1487_v1 }
 0xf28   :  { %v760_v9 = vpop.permute.xlu0 %759 }
 0xf29   :  { %v762_v10 = vmul.f32 %v1413_v7, %v760_v9 }
 0xf2b   :  { %764 = vrot.lane.b32.xlu1 %v762_v10, %s1488_s26 }
 0xf9d   :  { %v765_v11 = vpop.permute.xlu1 %764 }
 0xf9e   :  { %v767_v59 = vadd.f32 %v765_v11, %v757_v12 }
 0xfa0   :  { %1414 = vtanh.f32 %v767_v59 }
 0xfaa   :  { %v1415_v14 = vpop.eup %1414 }
 0xfab   :  { %770 = vrot.lane.b32.xlu0 %v1415_v14, %s1488_s26 }
0x101d   :  { %v771_v15 = vpop.permute.xlu0 %770 }
0x101e   :  { %v773_v16 = vmul.f32 %v1413_v7, %v771_v15 }
0x1020   :  { %775 = vrot.lane.b32.xlu1 %v773_v16, %s1489_s27 }
0x1092   :  { %v776_v17 = vpop.permute.xlu1 %775 }
0x1093   :  { %1277 = vmatmul.mubr.msk.f32.vlgmr.msra.gmra.mrb[12].mxu0 %vm175_vm2, %v776_v17 }
0x1094   :  { %1298 = vmatprep.mubr.msk.f32.mxu0 %vm1486_vm0, %v1487_v1  ;;  %1355 = vmatpush3.bf16.msra.mxu0 %v1354_v51 }
0x1095   :  { %1356 = vmatprep.subr.bf16.mxu0 %v1485_v0 }
0x1098   :  { %1358 = vmatpush3.bf16.msra.mxu0 %v1357_v53 }
0x1166   :  { %v845_v19 = vpop.f32.mrb[12].mxu0 }
0x1167   :  { %v849_v20 = vadd.f32 %v845_v19, %v167_v18  ;;  %v1278_v21 = vpop.f32.mrb[13].mxu0 }
0x1169   :  { %1416 = vtanh.f32 %v849_v20  ;;  %v1125_v23 = vmul.f32 -1.442695, %v849_v20 }
0x116b   :  { %1418 = vpow2.f32 %v1125_v23 }
0x1173   :  { %v1417_v22 = vpop.eup %1416 }
0x1174   :  { %859 = vrot.lane.b32.xlu0 %v1417_v22, %s1488_s26  ;;  %v1129_v22 = vld [vmem:[#allocation2 + $0x58] ss:$0 sm:$0xff] }
0x1175   :  { %v1419_v24 = vpop.eup %1418 }
0x1176   :  { %v853_v25 = vadd.f32 1.0, %v1419_v24 }
0x1178   :  { %1420 = vrcp.f32 %v853_v25 }
0x1182   :  { %v1421_v26 = vpop.eup %1420 }
0x1183   :  { %v857_v29 = vmul.f32 %v1421_v26, %v767_v59 }
0x11e6   :  { %v860_v27 = vpop.permute.xlu0 %859 }
0x11e7   :  { %v862_v28 = vmul.f32 %v1421_v26, %v860_v27 }
0x11e9   :  { %864 = vrot.lane.b32.xlu1 %v862_v28, %s1488_s26 }
0x125b   :  { %v865_v30 = vpop.permute.xlu1 %864 }
0x125c   :  { %v867_v62 = vadd.f32 %v865_v30, %v857_v29 }
0x125e   :  { %1422 = vtanh.f32 %v867_v62 }
0x1268   :  { %v1423_v31 = vpop.eup %1422 }
0x1269   :  { %870 = vrot.lane.b32.xlu0 %v1423_v31, %s1488_s26 }
0x12db   :  { %v871_v32 = vpop.permute.xlu0 %870 }
0x12dc   :  { %v873_v33 = vmul.f32 %v1421_v26, %v871_v32 }
0x12de   :  { %875 = vrot.lane.b32.xlu1 %v873_v33, %s1489_s27 }
0x1350   :  { %v876_v34 = vpop.permute.xlu1 %875 }
0x1351   :  { %1288 = vmatmul.mubr.msk.f32.vlgmr.msra.gmra.mrb[8].mxu1 %vm175_vm2, %v876_v34 }
0x1424   :  { %v945_v36 = vpop.f32.mrb[8].mxu1 }
0x1425   :  { %v949_v37 = vadd.f32 %v945_v36, %v172_v35  ;;  %v1289_v38 = vpop.f32.mrb[9].mxu1 }
0x1427   :  { %1424 = vtanh.f32 %v949_v37  ;;  %v1127_v40 = vmul.f32 -1.442695, %v949_v37 }
0x1429   :  { %1426 = vpow2.f32 %v1127_v40 }
0x1431   :  { %v1425_v39 = vpop.eup %1424 }
0x1432   :  { %959 = vrot.lane.b32.xlu0 %v1425_v39, %s1488_s26 }
0x1433   :  { %v1427_v41 = vpop.eup %1426 }
0x1434   :  { %v953_v42 = vadd.f32 1.0, %v1427_v41 }
0x1436   :  { %1428 = vrcp.f32 %v953_v42 }
0x1440   :  { %v1429_v43 = vpop.eup %1428 }
0x1441   :  { %v957_v46 = vmul.f32 %v1429_v43, %v867_v62 }
0x14a4   :  { %v960_v44 = vpop.permute.xlu0 %959 }
0x14a5   :  { %v962_v45 = vmul.f32 %v1429_v43, %v960_v44 }
0x14a7   :  { %964 = vrot.lane.b32.xlu1 %v962_v45, %s1488_s26 }
0x1519   :  { %v965_v47 = vpop.permute.xlu1 %964 }
0x151a   :  { %v967_v13 = vadd.f32 %v965_v47, %v957_v46 }
0x151c   :  { %1430 = vtanh.f32 %v967_v13 }
0x1526   :  { %v1431_v61 = vpop.eup %1430 }
0x1527   :  { %970 = vrot.lane.b32.xlu0 %v1431_v61, %s1488_s26 }
0x1599   :  { %v971_v57 = vpop.permute.xlu0 %970 }
0x159a   :  { %v973_v58 = vmul.f32 %v1429_v43, %v971_v57 }
0x159c   :  { %v979_v60 = vmul.f32 %v1128_v56, %v973_v58 }
0x159e   :  { %v981_v63 = vsel %vm980_vm4, %v979_v60, 0.0 }
0x159f   :  { %v982_v2 = vrot.slane %v981_v63, 4 }
0x15a1   :  { %v983_v3 = vadd.f32 %v982_v2, %v981_v63 }
0x15a3   :  { %v984_v4 = vrot.slane %v983_v3, 2 }
0x15a5   :  { %v985_v5 = vadd.f32 %v984_v4, %v983_v3 }
0x15a7   :  { %v986_v8 = vrot.slane %v985_v5, 1 }
0x15a9   :  { %v987_v6 = vadd.f32 %v986_v8, %v985_v5 }
0x15ab   :  { %v988_v7 = vmul.f32 0.5, %v987_v6 }
0x15ad   :  { %v989_v9 = vsub.f32 %v973_v58, %v988_v7 }
0x15af   :  { %v990_v0 = vmul.f32 %v1128_v56, %v989_v9 }
0x15b1   :  { %v991_v10 = vmul.f32 %v990_v0, %v990_v0 }
0x15b3   :  { %v992_v12 = vsel %vm980_vm4, %v991_v10, 0.0 }
0x15b4   :  { %v993_v11 = vrot.slane %v992_v12, 4 }
0x15b6   :  { %v994_v59 = vadd.f32 %v993_v11, %v992_v12 }
0x15b8   :  { %v995_v14 = vrot.slane %v994_v59, 2 }
0x15ba   :  { %v996_v1 = vadd.f32 %v995_v14, %v994_v59 }
0x15bc   :  { %v997_v15 = vrot.slane %v996_v1, 1 }
0x15be   :  { %v998_v16 = vadd.f32 %v997_v15, %v996_v1 }
0x15c0   :  { %v999_v17 = vmul.f32 0.5, %v998_v16 }
0x15c2   :  { %v1000_v18 = vadd.f32 1e-05, %v999_v17 }
0x15c4   :  { %1432 = vrsqrt.f32 %v1000_v18 }
0x15ce   :  { %v1433_v19 = vpop.eup %1432 }
0x15cf   :  { %v1002_v20 = vmul.f32 %v1433_v19, %v989_v9 }
0x15d1   :  { %1013 = vrot.lane.b32.xlu1 %v1002_v20, %s1489_s27 }
0x1643   :  { %v1014_v21 = vpop.permute.xlu1 %1013 }
0x1644   :  { %1299 = vmatmul.mubr.msk.f32.vlgmr.msra.gmra.mrb[14].mxu0 %vm175_vm2, %v1014_v21 }
0x1717   :  { %v1083_v23 = vpop.f32.mrb[14].mxu0 }
0x1718   :  { %v1084_v24 = vadd.f32 %v1129_v22, %v1083_v23  ;;  %v1300_v25 = vpop.f32.mrb[15].mxu0 }
0x171a   :  { %v1087_v26 = vmax.f32 %v1084_v24, 0.0 }
0x171c   :  { %1088 = vst [vmem:[#allocation5] sm:$0xff] %v1087_v26 }
0x171d   :  { %1467 = shalt.err (!%p1464_p12)
}
0x171e   :  { %s1468_s16 = scalar_lea.hbm %s1684_s2, 128 }
0x171f   :  { %p1469_p13 = scmp.ne.s32.totalorder %s1684_s2, %s1468_s16  ;;  %p1472_p0 = scmp.lt.u32.totalorder %s1468_s16, %s1684_s2 }
0x1721   :  { %p1474_p1 = pnand %p1472_p0, %p1469_p13 }
0x1723   :  { %1477 = shalt.err (!%p1474_p1)
}
0x1724   :  { %1098 = dma.vmem_to_hbm [thread:$0]  %s1096_s12, 128, %s1684_s2, [#allocation4]  }
0x1725   :  { %1480 = dma.done.wait [#allocation4], 128  }
0x1726   :  { %1481 = vsyncadd [#allocation4], 4294967168 }
0x1727   :  { %1102 = vsyncpa [#allocation3], 1 }
0x1728   :  { %1103 = vsyncpa [#allocation4], 1 }

</bundles_post_ra>
